<compile_context>
chip_gen: v5e
topology: v5e:2x2
jax: 0.10.0
libtpu: 0.0.40
codegen_flags: <defaults>
</compile_context>

<pallas_src>
import functools

import jax
import jax.numpy as jnp
from jax.experimental import pallas as pl
from jax.experimental.pallas import tpu as pltpu


def _masked_nll_kernel(expand_ref, x_ref, t_ref, acc_ref, *, num_classes, minor):
    """One grid step: consume a (Br, R*C) log-prob tile + (Br, R) encoded targets."""
    # Zero the tiny VMEM-resident per-shard accumulator on the first reduction step.
    @pl.when(pl.program_id(1) == 0)
    def _init():
        acc_ref[...] = jnp.zeros_like(acc_ref)

    x = x_ref[...].astype(jnp.float32)          # (br, minor)  folded log-probs
    t = t_ref[...]                              # (br, R)      encoded targets (-1 = drop)
    e = expand_ref[...]                         # (R,  minor)  constant 0/1 expansion

    # Per-lane target class via one small MXU matmul:
    #   e[p, m] = 1 iff m // C == p   =>   t_lane[g, m] = t[g, m // C]
    # Exact: single nonzero term per output, integer operands that are bf16/f32-exact.
    t_lane = jnp.dot(t, e, preferred_element_type=jnp.float32)           # (br, minor)

    # A lane is selected iff its class index (m % C) equals its row's (valid) target.
    cls = (jax.lax.broadcasted_iota(jnp.int32, (1, minor), 1)
           % num_classes).astype(jnp.float32)
    picked = jnp.where(t_lane == cls, x, 0.0)                             # (br, minor)

    # Row-reduce on the otherwise idle MXU (all 8 output rows are identical); the vst
    # slot never carries a full-tile accumulator any more.
    ones = jnp.ones((8, picked.shape[0]), dtype=jnp.float32)
    acc_ref[...] -= jnp.dot(ones, picked, preferred_element_type=jnp.float32)


def _default_num_shards():
    """One grid shard per TensorCore (2 on v7x, 1 on v5e/v6e); 1 if it can't be derived."""
    try:
        info = pltpu.get_tpu_info()
    except Exception:
        return 1
    for name in ("tensorcores_per_chip", "num_tensorcores", "cores_per_chip",
                 "num_cores", "core_count"):
        val = getattr(info, name, None)
        if isinstance(val, int) and 1 <= val <= 8:
            return val
    return 1


def masked_loss(inpt, targ, *, mask_value=0, block_bytes=4 * 1024 * 1024, num_shards=None):
    """inpt: (N, C) float log-probabilities, targ: (N,) int class ids. Returns scalar f32."""
    N, C = inpt.shape
    if num_shards is None:
        num_shards = _default_num_shards()

    # Denominator straight from the original (unpadded) targets — matches keep.sum().
    # NOTE: an all-masked batch yields 0/0 = NaN, exactly like the reference module.
    keep_count = jnp.sum((targ != mask_value).astype(jnp.float32))

    # "Super-fold": pack R original rows into one lane-dense vector row of R*C elements.
    # R = 128 keeps both the input blocks and the packed targets lane-dense for any C.
    R = 128
    if R * C * 4 * 8 > block_bytes:                  # huge-C fallback: shrink the fold
        R = max(8, (block_bytes // (C * 4 * 8)) // 8 * 8)
        # TODO(synk): very large class counts deserve a per-row gather kernel instead.
    minor = R * C

    sr_total = -(-N // R)                            # super-rows covering N
    sr_per_shard = -(-sr_total // num_shards)
    br = max(8, min(block_bytes // (minor * 4), sr_per_shard))
    br = -(-br // 16) * 16                           # sublane multiple (bf16-safe)
    steps = -(-sr_per_shard // br)                   # reduction-axis grid length
    sr_shard = steps * br
    n_pad = num_shards * sr_shard * R

    enc_dtype = jnp.bfloat16 if C <= 256 else jnp.float32   # class ids must stay exact

    t32 = targ.astype(jnp.int32)
    if n_pad != N:                                   # pad with masked rows (contribute 0)
        inpt = jnp.pad(inpt, ((0, n_pad - N), (0, 0)))
        t32 = jnp.pad(t32, (0, n_pad - N), constant_values=mask_value)

    # Encode: valid in-range target -> class id, masked / out-of-range -> -1 (never hits).
    valid = (t32 != mask_value) & (t32 >= 0) & (t32 < C)
    t_enc = jnp.where(valid, t32, -1).astype(enc_dtype)

    inpt_f = inpt.reshape(num_shards, sr_shard, minor)     # lane-dense fold (free reshape)
    targ_f = t_enc.reshape(num_shards, sr_shard, R)        # lane-dense packed targets

    # Constant 0/1 expansion matrix, built once in the wrapper and fetched once.
    expand = (jnp.arange(R, dtype=jnp.int32)[:, None]
              == (jnp.arange(minor, dtype=jnp.int32)[None, :] // C)).astype(enc_dtype)

    kernel = functools.partial(_masked_nll_kernel, num_classes=C, minor=minor)

    loss_parts = pl.pallas_call(
        kernel,
        out_shape=jax.ShapeDtypeStruct((num_shards, 8, minor), jnp.float32),
        grid_spec=pltpu.PrefetchScalarGridSpec(
            num_scalar_prefetch=0,
            grid=(num_shards, steps),
            in_specs=[
                pl.BlockSpec((R, minor), lambda i, j: (0, 0)),            # expansion matrix
                pl.BlockSpec((None, br, minor), lambda i, j: (i, j, 0)),  # inpt tile
                pl.BlockSpec((None, br, R), lambda i, j: (i, j, 0)),      # packed targets
            ],
            out_specs=pl.BlockSpec((None, 8, minor), lambda i, j: (i, 0, 0)),
        ),
        compiler_params=pltpu.CompilerParams(
            dimension_semantics=("parallel", "arbitrary"),
            vmem_limit_bytes=32 * 1024 * 1024,
        ),
    )(expand, inpt_f, targ_f)

    # All 8 accumulator rows are identical; row 0 across shards/lanes is the numerator.
    numerator = jnp.sum(loss_parts[:, 0, :])
    return numerator / keep_count


def masked_loss_ref(inpt, targ, mask_value=0):
    keep = targ != mask_value
    safe_t = jnp.where(keep, targ, 0)
    per_row = -jnp.take_along_axis(inpt, safe_t[:, None], axis=1)[:, 0]
    return jnp.sum(jnp.where(keep, per_row, 0.0)) / jnp.sum(keep)


if __name__ == "__main__":
    key = jax.random.PRNGKey(0)
    k1, k2 = jax.random.split(key)

    N, C = 2000, 16           # small demo; N deliberately not tile-aligned (exercises padding)
    logits = jax.random.normal(k1, (N, C), dtype=jnp.float32)
    inpt = jax.nn.log_softmax(logits, axis=-1)                  # NLLLoss expects log-probs
    targ = jax.random.randint(k2, (N,), 0, C, dtype=jnp.int32)  # class 0 == mask value

    out = masked_loss(inpt, targ)
    jax.block_until_ready(out)

    ref = masked_loss_ref(inpt, targ)
    assert jnp.allclose(out, ref, rtol=1e-4, atol=1e-4), (out, ref)

    print("KERNEL_OK")
</pallas_src>

<mosaic_0001>
module attributes {stable_mosaic.version = 11 : i64} {
  func.func @_masked_nll_kernel(%arg0: i32, %arg1: i32, %arg2: memref<128x2048xbf16, #tpu.memory_space<vmem>>, %arg3: memref<1x16x2048xf32, #tpu.memory_space<vmem>>, %arg4: memref<1x16x128xbf16, #tpu.memory_space<vmem>>, %arg5: memref<1x8x2048xf32, #tpu.memory_space<vmem>>) attributes {dimension_semantics = [#tpu.dimension_semantics<parallel>, #tpu.dimension_semantics<arbitrary>], iteration_bounds = array<i64: 1, 1>, scalar_prefetch = 0 : i64, scratch_operands = 0 : i64, tpu.core_type = #tpu.core_type<tc>, window_params = [{pipeline_mode = #tpu.pipeline_mode<synchronous>, transform_indices = @transform_0, window_bounds = array<i64: 128, 2048>}, {transform_indices = @transform_1, window_bounds = array<i64: 1, 16, 2048>}, {transform_indices = @transform_2, window_bounds = array<i64: 1, 16, 128>}, {transform_indices = @transform_3, window_bounds = array<i64: 1, 8, 2048>}]} {
    %c0_i32 = arith.constant 0 : i32
    %0 = arith.cmpi eq, %arg1, %c0_i32 : i32
    %1 = arith.extui %0 : i1 to i32
    %c0_i32_0 = arith.constant 0 : i32
    %2 = arith.cmpi ne, %1, %c0_i32_0 : i32
    scf.if %2 {
      %cst_21 = arith.constant 0.000000e+00 : f32
      %39 = vector.broadcast %cst_21 : f32 to vector<8x2048xf32>
      %c0_22 = arith.constant 0 : index
      %c0_23 = arith.constant 0 : index
      %c0_24 = arith.constant 0 : index
      %40 = vector.load %arg5[%c0_22, %c0_23, %c0_24] : memref<1x8x2048xf32, #tpu.memory_space<vmem>>, vector<1x8x2048xf32>
      %41 = vector.shape_cast %40 : vector<1x8x2048xf32> to vector<8x2048xf32>
      %42 = vector.shape_cast %39 : vector<8x2048xf32> to vector<1x8x2048xf32>
      tpu.vector_store %arg5[%c0_22, %c0_23, %c0_24], %42 {strides = array<i32>} : memref<1x8x2048xf32, #tpu.memory_space<vmem>>, vector<1x8x2048xf32>,
    } else {
    }
    %c0 = arith.constant 0 : index
    %c0_1 = arith.constant 0 : index
    %c0_2 = arith.constant 0 : index
    %3 = vector.load %arg3[%c0, %c0_1, %c0_2] : memref<1x16x2048xf32, #tpu.memory_space<vmem>>, vector<1x16x2048xf32>
    %4 = vector.shape_cast %3 : vector<1x16x2048xf32> to vector<16x2048xf32>
    %c0_3 = arith.constant 0 : index
    %c0_4 = arith.constant 0 : index
    %c0_5 = arith.constant 0 : index
    %5 = vector.load %arg4[%c0_3, %c0_4, %c0_5] : memref<1x16x128xbf16, #tpu.memory_space<vmem>>, vector<1x16x128xbf16>
    %6 = vector.shape_cast %5 : vector<1x16x128xbf16> to vector<16x128xbf16>
    %c0_6 = arith.constant 0 : index
    %c0_7 = arith.constant 0 : index
    %7 = vector.load %arg2[%c0_6, %c0_7] : memref<128x2048xbf16, #tpu.memory_space<vmem>>, vector<128x2048xbf16>
    %cst = arith.constant dense<0.000000e+00> : vector<16x2048xf32>
    %8 = tpu.matmul %6, %7, %cst {dimension_numbers = #tpu.dot_dimension_numbers<[1], [0], [0], [1], [0, 0, 1, 1], [], []>} : vector<16x128xbf16>, vector<128x2048xbf16>, vector<16x2048xf32> -> vector<16x2048xf32>
    %9 = tpu.iota {dimensions = array<i32: 1>} : vector<1x2048xi32>
    %c16_i32 = arith.constant 16 : i32
    %c0_i32_8 = arith.constant 0 : i32
    %10 = arith.cmpi eq, %c16_i32, %c0_i32_8 : i32
    %c1_i32 = arith.constant 1 : i32
    %11 = arith.select %10, %c1_i32, %c16_i32 : i32
    %12 = vector.broadcast %11 : i32 to vector<1x2048xi32>
    %13 = arith.remsi %9, %12 : vector<1x2048xi32>
    %c0_i32_9 = arith.constant 0 : i32
    %14 = vector.broadcast %c0_i32_9 : i32 to vector<1x2048xi32>
    %15 = arith.cmpi ne, %13, %14 : vector<1x2048xi32>
    %c0_i32_10 = arith.constant 0 : i32
    %16 = vector.broadcast %c0_i32_10 : i32 to vector<1x2048xi32>
    %17 = arith.cmpi slt, %13, %16 : vector<1x2048xi32>
    %c0_i32_11 = arith.constant 0 : i32
    %18 = arith.cmpi slt, %11, %c0_i32_11 : i32
    %19 = vector.broadcast %18 : i1 to vector<1x2048xi1>
    %20 = vector.broadcast %19 : vector<1x2048xi1> to vector<1x2048xi1>
    %21 = arith.xori %17, %20 : vector<1x2048xi1>
    %22 = arith.andi %21, %15 : vector<1x2048xi1>
    %23 = vector.broadcast %11 : i32 to vector<1x2048xi32>
    %24 = arith.addi %13, %23 : vector<1x2048xi32>
    %25 = arith.select %22, %24, %13 : vector<1x2048xi1>, vector<1x2048xi32>
    %26 = arith.sitofp %25 : vector<1x2048xi32> to vector<1x2048xf32>
    %27 = vector.broadcast %26 : vector<1x2048xf32> to vector<16x2048xf32>
    %28 = arith.cmpf oeq, %8, %27 : vector<16x2048xf32>
    %cst_12 = arith.constant 0.000000e+00 : f32
    %29 = vector.broadcast %cst_12 : f32 to vector<16x2048xf32>
    %30 = arith.select %28, %4, %29 : vector<16x2048xi1>, vector<16x2048xf32>
    %cst_13 = arith.constant 1.000000e+00 : f32
    %31 = vector.broadcast %cst_13 : f32 to vector<8x16xf32>
    %c0_14 = arith.constant 0 : index
    %c0_15 = arith.constant 0 : index
    %c0_16 = arith.constant 0 : index
    %32 = vector.load %arg5[%c0_14, %c0_15, %c0_16] : memref<1x8x2048xf32, #tpu.memory_space<vmem>>, vector<1x8x2048xf32>
    %33 = vector.shape_cast %32 : vector<1x8x2048xf32> to vector<8x2048xf32>
    %cst_17 = arith.constant dense<0.000000e+00> : vector<8x2048xf32>
    %34 = tpu.matmul %31, %30, %cst_17 {dimension_numbers = #tpu.dot_dimension_numbers<[1], [0], [0], [1], [0, 0, 1, 1], [], []>} : vector<8x16xf32>, vector<16x2048xf32>, vector<8x2048xf32> -> vector<8x2048xf32>
    %35 = arith.subf %33, %34 : vector<8x2048xf32>
    %c0_18 = arith.constant 0 : index
    %c0_19 = arith.constant 0 : index
    %c0_20 = arith.constant 0 : index
    %36 = vector.load %arg5[%c0_18, %c0_19, %c0_20] : memref<1x8x2048xf32, #tpu.memory_space<vmem>>, vector<1x8x2048xf32>
    %37 = vector.shape_cast %36 : vector<1x8x2048xf32> to vector<8x2048xf32>
    %38 = vector.shape_cast %35 : vector<8x2048xf32> to vector<1x8x2048xf32>
    tpu.vector_store %arg5[%c0_18, %c0_19, %c0_20], %38 {strides = array<i32>} : memref<1x8x2048xf32, #tpu.memory_space<vmem>>, vector<1x8x2048xf32>,
    return
  }
  func.func @transform_0(%arg0: i32, %arg1: i32) -> (i32, i32) {
    %c0_i32 = arith.constant 0 : i32
    %c0_i32_0 = arith.constant 0 : i32
    %c0_i32_1 = arith.constant 0 : i32
    return %c0_i32, %c0_i32_0 : i32, i32
  }
  func.func @transform_1(%arg0: i32, %arg1: i32) -> (i32, i32, i32) {
    %c0_i32 = arith.constant 0 : i32
    %c0_i32_0 = arith.constant 0 : i32
    return %arg0, %arg1, %c0_i32 : i32, i32, i32
  }
  func.func @transform_2(%arg0: i32, %arg1: i32) -> (i32, i32, i32) {
    %c0_i32 = arith.constant 0 : i32
    %c0_i32_0 = arith.constant 0 : i32
    return %arg0, %arg1, %c0_i32 : i32, i32, i32
  }
  func.func @transform_3(%arg0: i32, %arg1: i32) -> (i32, i32, i32) {
    %c0_i32 = arith.constant 0 : i32
    %c0_i32_0 = arith.constant 0 : i32
    %c0_i32_1 = arith.constant 0 : i32
    return %arg0, %c0_i32, %c0_i32_0 : i32, i32, i32
  }
}

</mosaic_0001>

<bundles_post_ra>
// kernel: tpu_custom_call.1
= control target key start
LH: loop header
LB: loop body
LE: loop exit
PB: predicated region body
PF: predicated region fallthrough
CT: control target
= control target key end

     0   :  { %8 = vsyncpa [#allocation3], 0  ;;  %s2710_s0 = inlined_call_operand.hbm [shape: bf16[128,2048], index: 0, kind: input, shape index: {}]   ;;  %s2711_s1 = inlined_call_operand.hbm [shape: f32[1,16,2048], index: 1, kind: input, shape index: {}]   ;;  %s2712_s2 = inlined_call_operand.hbm [shape: bf16[1,16,128], index: 2, kind: input, shape index: {}]   ;;  %s2713_s3 = inlined_call_operand.hbm [shape: f32[1,8,2048], index: 3, kind: output, shape index: {}]  }
   0x1   :  { %9 = vsyncpa [#allocation6], 0  ;;  %s28_s14 = sshll.u32 %s2711_s1, 4  ;;  %s29_s14 = int_to_ptr.hbm [resolvable:$true] %s28_s14 }
   0x2   :  { %10 = vsyncpa [#allocation4], 0  ;;  %s2599_s15 = smov [#allocation5]   ;;  %s15_s19 = sshll.u32 %s2710_s0, 4  ;;  %s16_s19 = int_to_ptr.hbm [resolvable:$true] %s15_s19 }
   0x3   :  { %s30_s16 = sshll.u32 %s2599_s15, 4  ;;  %s2600_s20 = smov 2048   ;;  %s31_s16 = int_to_ptr.vmem [resolvable:$true] %s30_s16 }
   0x4   :  { %s2601_s21 = smov 128   ;;  %s2602_s22 = smov [#allocation2]  }
   0x5   :  { %36 = dma.hbm_to_vmem [thread:$0]  %s29_s14, 4096, %s31_s16, [#allocation6], %s2600_s20, %s2600_s20, %s2601_s21  }
   0x6   :  { %s17_s23 = sshll.u32 %s2602_s22, 4  ;;  %s2603_s24 = smov 1024   ;;  %s18_s23 = int_to_ptr.vmem [resolvable:$true] %s17_s23 }
   0x7   :  { %s2604_s25 = smov 64   ;;  %s41_s27 = sshll.u32 %s2712_s2, 4  ;;  %s42_s27 = int_to_ptr.hbm [resolvable:$true] %s41_s27 }
   0x8   :  { %23 = dma.hbm_to_vmem [thread:$0]  %s16_s19, 16384, %s18_s23, [#allocation3], %s2603_s24, %s2603_s24, %s2604_s25  }
   0x9   :  { %s2605_s28 = smov [#allocation7]   ;;  %s2606_s30 = smov 4  }
   0xa   :  { %s43_s29 = sshll.u32 %s2605_s28, 4  ;;  %s44_s29 = int_to_ptr.vmem [resolvable:$true] %s43_s29 }
   0xb   :  { %49 = dma.hbm_to_vmem [thread:$0]  %s42_s27, 128, %s44_s29, [#allocation6], %s2604_s25, %s2604_s25, %s2606_s30  }
   0xc   :  { %2593 = dma.done.wait [#allocation3], 16384  }
   0xd   :  { %2594 = vsyncadd [#allocation3], 4294950912 }
   0xe   :  { %2595 = dma.done.wait [#allocation6], 4224  }
   0xf   :  { %2596 = vsyncadd [#allocation6], 4294963072  ;;  %v2255_v0 = vld [vmem:[#allocation2 + $0x388] sm:$0xf]  ;;  %v2471_v2 = vld [vmem:[#allocation2 + $0x38c] sm:$0xf] }
  0x10   :  { %v2479_v1 = vld [vmem:[#allocation2 + $0x3c4] sm:$0xf0]  ;;  %v2257_v4 = vld [vmem:[#allocation2 + $0x3c8] sm:$0xf0]  ;;  %v2247_v5 = vld [vmem:[#allocation2 + $0x380] sm:$0xf] }
  0x11   :  { %v2256_v3 = vor.u32 %v2479_v1, %v2255_v0  ;;  %v2478_v6 = vld [vmem:[#allocation2 + $0x3bc] sm:$0xf0]  ;;  %v2260_v7 = vor.u32 %v2471_v2, %v2257_v4  ;;  %v2470_v9 = vld [vmem:[#allocation2 + $0x384] sm:$0xf]  ;;  %v2191_v11 = vld [vmem:[#allocation2 + $0x308] sm:$0xf] }
  0x12   :  { %v2248_v8 = vor.u32 %v2478_v6, %v2247_v5  ;;  %v2249_v10 = vld [vmem:[#allocation2 + $0x3c0] sm:$0xf0]  ;;  %v2463_v13 = vld [vmem:[#allocation2 + $0x344] sm:$0xf0]  ;;  %v2455_v14 = vld [vmem:[#allocation2 + $0x30c] sm:$0xf] }
  0x13   :  { %918 = vmatpush.bf16.msra.mxu2 %v2256_v3  ;;  %v2252_v12 = vor.u32 %v2470_v9, %v2249_v10  ;;  %v2193_v15 = vld [vmem:[#allocation2 + $0x348] sm:$0xf0]  ;;  %932 = vmatpush.bf16.msra.mxu3 %v2260_v7  ;;  %v2192_v16 = vor.u32 %v2463_v13, %v2191_v11  ;;  %v2183_v18 = vld [vmem:[#allocation2 + $0x300] sm:$0xf]  ;;  %v2454_v20 = vld [vmem:[#allocation2 + $0x304] sm:$0xf] }
  0x14   :  { %890 = vmatpush.bf16.msra.mxu0 %v2248_v8  ;;  %v2196_v17 = vor.u32 %v2455_v14, %v2193_v15  ;;  %v2462_v19 = vld [vmem:[#allocation2 + $0x33c] sm:$0xf0]  ;;  %v2185_v22 = vld [vmem:[#allocation2 + $0x340] sm:$0xf0]  ;;  %v2127_v23 = vld [vmem:[#allocation2 + $0x288] sm:$0xf] }
  0x15   :  { %904 = vmatpush.bf16.msra.mxu1 %v2252_v12  ;;  %v2184_v21 = vor.u32 %v2462_v19, %v2183_v18  ;;  %v2447_v24 = vld [vmem:[#allocation2 + $0x2c4] sm:$0xf0]  ;;  %v2188_v25 = vor.u32 %v2454_v20, %v2185_v22  ;;  %v2439_v26 = vld [vmem:[#allocation2 + $0x28c] sm:$0xf]  ;;  %v2119_v28 = vld [vmem:[#allocation2 + $0x280] sm:$0xf] }
  0x16   :  { %v2129_v27 = vld [vmem:[#allocation2 + $0x2c8] sm:$0xf0]  ;;  %v2128_v29 = vor.u32 %v2447_v24, %v2127_v23  ;;  %v2446_v30 = vld [vmem:[#allocation2 + $0x2bc] sm:$0xf0]  ;;  %v2438_v31 = vld [vmem:[#allocation2 + $0x284] sm:$0xf] }
  0x17   :  { %919 = vmatpush.bf16.msra.mxu2 %v2192_v16  ;;  %v2121_v32 = vld [vmem:[#allocation2 + $0x2c0] sm:$0xf0]  ;;  %933 = vmatpush.bf16.msra.mxu3 %v2196_v17  ;;  %v2132_v33 = vor.u32 %v2439_v26, %v2129_v27  ;;  %v2120_v34 = vor.u32 %v2446_v30, %v2119_v28  ;;  %v2063_v35 = vld [vmem:[#allocation2 + $0x208] sm:$0xf]  ;;  %v2423_v37 = vld [vmem:[#allocation2 + $0x20c] sm:$0xf] }
  0x18   :  { %891 = vmatpush.bf16.msra.mxu0 %v2184_v21  ;;  %v2431_v36 = vld [vmem:[#allocation2 + $0x244] sm:$0xf0]  ;;  %v2124_v38 = vor.u32 %v2438_v31, %v2121_v32  ;;  %v2065_v39 = vld [vmem:[#allocation2 + $0x248] sm:$0xf0]  ;;  %v2055_v40 = vld [vmem:[#allocation2 + $0x200] sm:$0xf] }
  0x19   :  { %905 = vmatpush.bf16.msra.mxu1 %v2188_v25  ;;  %v2430_v41 = vld [vmem:[#allocation2 + $0x23c] sm:$0xf0]  ;;  %v2422_v42 = vld [vmem:[#allocation2 + $0x204] sm:$0xf]  ;;  %v2064_v44 = vor.u32 %v2431_v36, %v2063_v35  ;;  %v2068_v45 = vor.u32 %v2423_v37, %v2065_v39  ;;  %v1999_v47 = vld [vmem:[#allocation2 + $0x188] sm:$0xf] }
  0x1a   :  { %v2057_v43 = vld [vmem:[#allocation2 + $0x240] sm:$0xf0]  ;;  %v2056_v46 = vor.u32 %v2430_v41, %v2055_v40  ;;  %v2415_v48 = vld [vmem:[#allocation2 + $0x1c4] sm:$0xf0]  ;;  %v2407_v49 = vld [vmem:[#allocation2 + $0x18c] sm:$0xf] }
  0x1b   :  { %920 = vmatpush.bf16.msra.mxu2 %v2128_v29  ;;  %934 = vmatpush.bf16.msra.mxu3 %v2132_v33  ;;  %v2060_v50 = vor.u32 %v2422_v42, %v2057_v43  ;;  %v2001_v51 = vld [vmem:[#allocation2 + $0x1c8] sm:$0xf0]  ;;  %v1991_v52 = vld [vmem:[#allocation2 + $0x180] sm:$0xf]  ;;  %v2406_v54 = vld [vmem:[#allocation2 + $0x184] sm:$0xf]  ;;  %v2000_v56 = vor.u32 %v2415_v48, %v1999_v47 }
  0x1c   :  { %892 = vmatpush.bf16.msra.mxu0 %v2120_v34  ;;  %v2414_v53 = vld [vmem:[#allocation2 + $0x1bc] sm:$0xf0]  ;;  %v1993_v55 = vld [vmem:[#allocation2 + $0x1c0] sm:$0xf0]  ;;  %v2004_v57 = vor.u32 %v2407_v49, %v2001_v51  ;;  %v1935_v59 = vld [vmem:[#allocation2 + $0x108] sm:$0xf] }
  0x1d   :  { %906 = vmatpush.bf16.msra.mxu1 %v2124_v38  ;;  %v1992_v58 = vor.u32 %v2414_v53, %v1991_v52  ;;  %v2399_v60 = vld [vmem:[#allocation2 + $0x144] sm:$0xf0]  ;;  %v2391_v61 = vld [vmem:[#allocation2 + $0x10c] sm:$0xf]  ;;  %v1996_v62 = vor.u32 %v2406_v54, %v1993_v55  ;;  %v1927_v0 = vld [vmem:[#allocation2 + $0x100] sm:$0xf] }
  0x1e   :  { %v1937_v63 = vld [vmem:[#allocation2 + $0x148] sm:$0xf0]  ;;  %v2398_v1 = vld [vmem:[#allocation2 + $0x13c] sm:$0xf0]  ;;  %v2390_v2 = vld [vmem:[#allocation2 + $0x104] sm:$0xf]  ;;  %v1936_v4 = vor.u32 %v2399_v60, %v1935_v59 }
  0x1f   :  { %921 = vmatpush.bf16.msra.mxu2 %v2064_v44  ;;  %935 = vmatpush.bf16.msra.mxu3 %v2068_v45  ;;  %v1929_v3 = vld [vmem:[#allocation2 + $0x140] sm:$0xf0]  ;;  %v1940_v5 = vor.u32 %v2391_v61, %v1937_v63  ;;  %v1928_v6 = vor.u32 %v2398_v1, %v1927_v0  ;;  %v1871_v7 = vld [vmem:[#allocation2 + $0x88] sm:$0xf]  ;;  %v2375_v9 = vld [vmem:[#allocation2 + $0x8c] sm:$0xf] }
  0x20   :  { %893 = vmatpush.bf16.msra.mxu0 %v2056_v46  ;;  %v2383_v8 = vld [vmem:[#allocation2 + $0xc4] sm:$0xf0]  ;;  %v1932_v10 = vor.u32 %v2390_v2, %v1929_v3  ;;  %v1873_v11 = vld [vmem:[#allocation2 + $0xc8] sm:$0xf0]  ;;  %v1863_v12 = vld [vmem:[#allocation2 + $0x80] sm:$0xf] }
  0x21   :  { %907 = vmatpush.bf16.msra.mxu1 %v2060_v50  ;;  %v2382_v13 = vld [vmem:[#allocation2 + $0xbc] sm:$0xf0]  ;;  %v2374_v14 = vld [vmem:[#allocation2 + $0x84] sm:$0xf]  ;;  %v1872_v16 = vor.u32 %v2383_v8, %v1871_v7  ;;  %v1807_v17 = vld [vmem:[#allocation2 + $0x8] sm:$0xf]  ;;  %v1876_v19 = vor.u32 %v2375_v9, %v1873_v11 }
  0x22   :  { %v1865_v15 = vld [vmem:[#allocation2 + $0xc0] sm:$0xf0]  ;;  %v2367_v18 = vld [vmem:[#allocation2 + $0x44] sm:$0xf0]  ;;  %v1864_v20 = vor.u32 %v2382_v13, %v1863_v12  ;;  %v2359_v21 = vld [vmem:[#allocation2 + $0xc] sm:$0xf] }
  0x23   :  { %922 = vmatpush.bf16.msra.mxu2 %v2000_v56  ;;  %936 = vmatpush.bf16.msra.mxu3 %v2004_v57  ;;  %v1809_v22 = vld [vmem:[#allocation2 + $0x48] sm:$0xf0]  ;;  %v2271_v23 = vld [vmem:[#allocation2 + $0x398] sm:$0xf]  ;;  %v1868_v24 = vor.u32 %v2374_v14, %v1865_v15  ;;  %v2473_v26 = vld [vmem:[#allocation2 + $0x39c] sm:$0xf]  ;;  %v1808_v31 = vor.u32 %v2367_v18, %v1807_v17 }
  0x24   :  { %894 = vmatpush.bf16.msra.mxu0 %v1992_v58  ;;  %v2481_v25 = vld [vmem:[#allocation2 + $0x3d4] sm:$0xf0]  ;;  %v2273_v27 = vld [vmem:[#allocation2 + $0x3d8] sm:$0xf0]  ;;  %v1799_v28 = vld [vmem:[#allocation2] sm:$0xf]  ;;  %v1812_v35 = vor.u32 %v2359_v21, %v1809_v22 }
  0x25   :  { %908 = vmatpush.bf16.msra.mxu1 %v1996_v62  ;;  %v2366_v29 = vld [vmem:[#allocation2 + $0x3c] sm:$0xf0]  ;;  %v2358_v30 = vld [vmem:[#allocation2 + $0x4] sm:$0xf]  ;;  %v2263_v33 = vld [vmem:[#allocation2 + $0x390] sm:$0xf]  ;;  %v2272_v36 = vor.u32 %v2481_v25, %v2271_v23  ;;  %v2276_v39 = vor.u32 %v2473_v26, %v2273_v27 }
  0x26   :  { %v1801_v32 = vld [vmem:[#allocation2 + $0x40] sm:$0xf0]  ;;  %v2480_v34 = vld [vmem:[#allocation2 + $0x3cc] sm:$0xf0]  ;;  %v2472_v37 = vld [vmem:[#allocation2 + $0x394] sm:$0xf]  ;;  %v1800_v40 = vor.u32 %v2366_v29, %v1799_v28 }
  0x27   :  { %923 = vmatpush.bf16.msra.mxu2 %v1936_v4  ;;  %937 = vmatpush.bf16.msra.mxu3 %v1940_v5  ;;  %v2265_v38 = vld [vmem:[#allocation2 + $0x3d0] sm:$0xf0]  ;;  %v2207_v41 = vld [vmem:[#allocation2 + $0x318] sm:$0xf]  ;;  %v1804_v43 = vor.u32 %v2358_v30, %v1801_v32  ;;  %v2264_v44 = vor.u32 %v2480_v34, %v2263_v33  ;;  %v2457_v45 = vld [vmem:[#allocation2 + $0x31c] sm:$0xf] }
  0x28   :  { %895 = vmatpush.bf16.msra.mxu0 %v1928_v6  ;;  %v2465_v42 = vld [vmem:[#allocation2 + $0x354] sm:$0xf0]  ;;  %v2209_v46 = vld [vmem:[#allocation2 + $0x358] sm:$0xf0]  ;;  %v2268_v47 = vor.u32 %v2472_v37, %v2265_v38  ;;  %v2199_v48 = vld [vmem:[#allocation2 + $0x310] sm:$0xf] }
  0x29   :  { %909 = vmatpush.bf16.msra.mxu1 %v1932_v10  ;;  %v2464_v49 = vld [vmem:[#allocation2 + $0x34c] sm:$0xf0]  ;;  %v2208_v50 = vor.u32 %v2465_v42, %v2207_v41  ;;  %v2456_v51 = vld [vmem:[#allocation2 + $0x314] sm:$0xf]  ;;  %v2212_v53 = vor.u32 %v2457_v45, %v2209_v46  ;;  %v2143_v54 = vld [vmem:[#allocation2 + $0x298] sm:$0xf] }
  0x2a   :  { %v2201_v52 = vld [vmem:[#allocation2 + $0x350] sm:$0xf0]  ;;  %v2449_v55 = vld [vmem:[#allocation2 + $0x2d4] sm:$0xf0]  ;;  %v2200_v56 = vor.u32 %v2464_v49, %v2199_v48  ;;  %v2441_v57 = vld [vmem:[#allocation2 + $0x29c] sm:$0xf] }
  0x2b   :  { %924 = vmatpush.bf16.msra.mxu2 %v1872_v16  ;;  %938 = vmatpush.bf16.msra.mxu3 %v1876_v19  ;;  %v2145_v58 = vld [vmem:[#allocation2 + $0x2d8] sm:$0xf0]  ;;  %v2638_v59 = vld [vmem:[#allocation7] sm:$0xff]  ;;  %v2204_v60 = vor.u32 %v2456_v51, %v2201_v52  ;;  %v2135_v61 = vld [vmem:[#allocation2 + $0x290] sm:$0xf]  ;;  %v2144_v63 = vor.u32 %v2449_v55, %v2143_v54  ;;  %vm1419_vm12 = vcmask 130048  }
  0x2c   :  { %896 = vmatpush.bf16.msra.mxu0 %v1864_v20  ;;  %v2448_v62 = vld [vmem:[#allocation2 + $0x2cc] sm:$0xf0]  ;;  %v2440_v0 = vld [vmem:[#allocation2 + $0x294] sm:$0xf]  ;;  %v2148_v2 = vor.u32 %v2441_v57, %v2145_v58  ;;  %v2079_v3 = vld [vmem:[#allocation2 + $0x218] sm:$0xf] }
  0x2d   :  { %910 = vmatpush.bf16.msra.mxu1 %v1868_v24  ;;  %v2137_v1 = vld [vmem:[#allocation2 + $0x2d0] sm:$0xf0]  ;;  %v2433_v4 = vld [vmem:[#allocation2 + $0x254] sm:$0xf0]  ;;  %v2136_v5 = vor.u32 %v2448_v62, %v2135_v61  ;;  %v2425_v6 = vld [vmem:[#allocation2 + $0x21c] sm:$0xf] }
  0x2e   :  { %v2081_v7 = vld [vmem:[#allocation2 + $0x258] sm:$0xf0]  ;;  %v2140_v8 = vor.u32 %v2440_v0, %v2137_v1  ;;  %v2071_v9 = vld [vmem:[#allocation2 + $0x210] sm:$0xf]  ;;  %v2080_v11 = vor.u32 %v2433_v4, %v2079_v3  ;;  %v2424_v12 = vld [vmem:[#allocation2 + $0x214] sm:$0xf] }
  0x2f   :  { %925 = vmatpush.bf16.msra.mxu2 %v1808_v31  ;;  %939 = vmatpush.bf16.msra.mxu3 %v1812_v35  ;;  %v2432_v10 = vld [vmem:[#allocation2 + $0x24c] sm:$0xf0]  ;;  %v2073_v13 = vld [vmem:[#allocation2 + $0x250] sm:$0xf0]  ;;  %v2084_v14 = vor.u32 %v2425_v6, %v2081_v7  ;;  %v2015_v15 = vld [vmem:[#allocation2 + $0x198] sm:$0xf] }
  0x30   :  { %897 = vmatpush.bf16.msra.mxu0 %v1800_v40  ;;  %v2417_v16 = vld [vmem:[#allocation2 + $0x1d4] sm:$0xf0]  ;;  %v2072_v17 = vor.u32 %v2432_v10, %v2071_v9  ;;  %v2409_v18 = vld [vmem:[#allocation2 + $0x19c] sm:$0xf]  ;;  %v2076_v20 = vor.u32 %v2424_v12, %v2073_v13  ;;  %v2007_v21 = vld [vmem:[#allocation2 + $0x190] sm:$0xf] }
  0x31   :  { %911 = vmatpush.bf16.msra.mxu1 %v1804_v43  ;;  %v2017_v19 = vld [vmem:[#allocation2 + $0x1d8] sm:$0xf0]  ;;  %v2416_v22 = vld [vmem:[#allocation2 + $0x1cc] sm:$0xf0]  ;;  %v2016_v23 = vor.u32 %v2417_v16, %v2015_v15  ;;  %v2408_v24 = vld [vmem:[#allocation2 + $0x194] sm:$0xf] }
  0x32   :  { %940 = vmatmul.bf16.vlgmr.msra.gmra.mxu3 %v2638_v59  ;;  %926 = vmatmul.bf16.vlgmr.msra.gmra.mxu2 %v2638_v59  ;;  %v2009_v25 = vld [vmem:[#allocation2 + $0x1d0] sm:$0xf0]  ;;  %v2020_v26 = vor.u32 %v2409_v18, %v2017_v19  ;;  %v1951_v27 = vld [vmem:[#allocation2 + $0x118] sm:$0xf]  ;;  %v2008_v29 = vor.u32 %v2416_v22, %v2007_v21  ;;  %v2393_v30 = vld [vmem:[#allocation2 + $0x11c] sm:$0xf] }
  0x33   :  { %974 = vmatpush.bf16.msrb.mxu2 %v2272_v36  ;;  %988 = vmatpush.bf16.msrb.mxu3 %v2276_v39  ;;  %v2401_v28 = vld [vmem:[#allocation2 + $0x154] sm:$0xf0]  ;;  %v1953_v31 = vld [vmem:[#allocation2 + $0x158] sm:$0xf0]  ;;  %v2012_v32 = vor.u32 %v2408_v24, %v2009_v25  ;;  %v1943_v33 = vld [vmem:[#allocation2 + $0x110] sm:$0xf] }
  0x34   :  { %946 = vmatpush.bf16.msrb.mxu0 %v2264_v44  ;;  %912 = vmatmul.bf16.vlgmr.msra.gmra.mxu1 %v2638_v59  ;;  %v2400_v34 = vld [vmem:[#allocation2 + $0x14c] sm:$0xf0]  ;;  %v1952_v35 = vor.u32 %v2401_v28, %v1951_v27  ;;  %v2392_v36 = vld [vmem:[#allocation2 + $0x114] sm:$0xf]  ;;  %v1956_v38 = vor.u32 %v2393_v30, %v1953_v31  ;;  %v1887_v39 = vld [vmem:[#allocation2 + $0x98] sm:$0xf] }
  0x35   :  { %960 = vmatpush.bf16.msrb.mxu1 %v2268_v47  ;;  %898 = vmatmul.bf16.vlgmr.msra.gmra.mxu0 %v2638_v59  ;;  %v1945_v37 = vld [vmem:[#allocation2 + $0x150] sm:$0xf0]  ;;  %v2385_v40 = vld [vmem:[#allocation2 + $0xd4] sm:$0xf0]  ;;  %v1944_v41 = vor.u32 %v2400_v34, %v1943_v33  ;;  %v2377_v42 = vld [vmem:[#allocation2 + $0x9c] sm:$0xf] }
  0x36   :  { %v1889_v43 = vld [vmem:[#allocation2 + $0xd8] sm:$0xf0]  ;;  %v1948_v44 = vor.u32 %v2392_v36, %v1945_v37  ;;  %v1879_v45 = vld [vmem:[#allocation2 + $0x90] sm:$0xf]  ;;  %v2376_v47 = vld [vmem:[#allocation2 + $0x94] sm:$0xf]  ;;  %v1888_v48 = vor.u32 %v2385_v40, %v1887_v39 }
  0x37   :  { %975 = vmatpush.bf16.msrb.mxu2 %v2208_v50  ;;  %989 = vmatpush.bf16.msrb.mxu3 %v2212_v53  ;;  %v2384_v46 = vld [vmem:[#allocation2 + $0xcc] sm:$0xf0]  ;;  %v1881_v49 = vld [vmem:[#allocation2 + $0xd0] sm:$0xf0]  ;;  %v1823_v50 = vld [vmem:[#allocation2 + $0x18] sm:$0xf]  ;;  %v1892_v52 = vor.u32 %v2377_v42, %v1889_v43 }
  0x38   :  { %947 = vmatpush.bf16.msrb.mxu0 %v2200_v56  ;;  %v2369_v51 = vld [vmem:[#allocation2 + $0x54] sm:$0xf0]  ;;  %v2361_v53 = vld [vmem:[#allocation2 + $0x1c] sm:$0xf]  ;;  %v2287_v55 = vld [vmem:[#allocation2 + $0x3a8] sm:$0xf]  ;;  %v1880_v56 = vor.u32 %v2384_v46, %v1879_v45  ;;  %v1884_v61 = vor.u32 %v2376_v47, %v1881_v49 }
  0x39   :  { %961 = vmatpush.bf16.msrb.mxu1 %v2204_v60  ;;  %v1825_v54 = vld [vmem:[#allocation2 + $0x58] sm:$0xf0]  ;;  %v2483_v57 = vld [vmem:[#allocation2 + $0x3e4] sm:$0xf0]  ;;  %v2475_v58 = vld [vmem:[#allocation2 + $0x3ac] sm:$0xf]  ;;  %v1824_v1 = vor.u32 %v2369_v51, %v1823_v50 }
  0x3a   :  { %v2289_v60 = vld [vmem:[#allocation2 + $0x3e8] sm:$0xf0]  ;;  %v1815_v62 = vld [vmem:[#allocation2 + $0x10] sm:$0xf]  ;;  %v2360_v0 = vld [vmem:[#allocation2 + $0x14] sm:$0xf]  ;;  %v2288_v6 = vor.u32 %v2483_v57, %v2287_v55 }
  0x3b   :  { %976 = vmatpush.bf16.msrb.mxu2 %v2144_v63  ;;  %990 = vmatpush.bf16.msrb.mxu3 %v2148_v2  ;;  %v2368_v63 = vld [vmem:[#allocation2 + $0x4c] sm:$0xf0]  ;;  %v1817_v2 = vld [vmem:[#allocation2 + $0x50] sm:$0xf0]  ;;  %v2279_v3 = vld [vmem:[#allocation2 + $0x3a0] sm:$0xf]  ;;  %v2292_v9 = vor.u32 %v2475_v58, %v2289_v60 }
  0x3c   :  { %948 = vmatpush.bf16.msrb.mxu0 %v2136_v5  ;;  %v2482_v4 = vld [vmem:[#allocation2 + $0x3dc] sm:$0xf0]  ;;  %v1828_v5 = vor.u32 %v2361_v53, %v1825_v54  ;;  %v2474_v7 = vld [vmem:[#allocation2 + $0x3a4] sm:$0xf]  ;;  %v1816_v10 = vor.u32 %v2368_v63, %v1815_v62  ;;  %v2467_v12 = vld [vmem:[#allocation2 + $0x364] sm:$0xf0]  ;;  %v1820_v13 = vor.u32 %v2360_v0, %v1817_v2 }
  0x3d   :  { %962 = vmatpush.bf16.msrb.mxu1 %v2140_v8  ;;  %v2281_v8 = vld [vmem:[#allocation2 + $0x3e0] sm:$0xf0]  ;;  %v2459_v15 = vld [vmem:[#allocation2 + $0x32c] sm:$0xf]  ;;  %v2215_v18 = vld [vmem:[#allocation2 + $0x320] sm:$0xf] }
  0x3e   :  { %v2225_v16 = vld [vmem:[#allocation2 + $0x368] sm:$0xf0]  ;;  %v2466_v19 = vld [vmem:[#allocation2 + $0x35c] sm:$0xf0]  ;;  %v2458_v21 = vld [vmem:[#allocation2 + $0x324] sm:$0xf] }
  0x3f   :  { %977 = vmatpush.bf16.msrb.mxu2 %v2080_v11  ;;  %991 = vmatpush.bf16.msrb.mxu3 %v2084_v14  ;;  %v2223_v11 = vld [vmem:[#allocation2 + $0x328] sm:$0xf]  ;;  %v2280_v14 = vor.u32 %v2482_v4, %v2279_v3  ;;  %v2217_v22 = vld [vmem:[#allocation2 + $0x360] sm:$0xf0]  ;;  %v2443_v27 = vld [vmem:[#allocation2 + $0x2ac] sm:$0xf] }
  0x40   :  { %949 = vmatpush.bf16.msrb.mxu0 %v2072_v17  ;;  %v2284_v17 = vor.u32 %v2474_v7, %v2281_v8  ;;  %v2159_v24 = vld [vmem:[#allocation2 + $0x2a8] sm:$0xf]  ;;  %v2161_v28 = vld [vmem:[#allocation2 + $0x2e8] sm:$0xf0]  ;;  %v2151_v30 = vld [vmem:[#allocation2 + $0x2a0] sm:$0xf] }
  0x41   :  { %963 = vmatpush.bf16.msrb.mxu1 %v2076_v20  ;;  %v2224_v20 = vor.u32 %v2467_v12, %v2223_v11  ;;  %v2451_v25 = vld [vmem:[#allocation2 + $0x2e4] sm:$0xf0]  ;;  %v2450_v31 = vld [vmem:[#allocation2 + $0x2dc] sm:$0xf0]  ;;  %v2442_v33 = vld [vmem:[#allocation2 + $0x2a4] sm:$0xf] }
  0x42   :  { %v2153_v34 = vld [vmem:[#allocation2 + $0x2e0] sm:$0xf0]  ;;  %v2095_v36 = vld [vmem:[#allocation2 + $0x228] sm:$0xf]  ;;  %v2427_v39 = vld [vmem:[#allocation2 + $0x22c] sm:$0xf] }
  0x43   :  { %978 = vmatpush.bf16.msrb.mxu2 %v2016_v23  ;;  %992 = vmatpush.bf16.msrb.mxu3 %v2020_v26  ;;  %v2228_v23 = vor.u32 %v2459_v15, %v2225_v16  ;;  %v2216_v26 = vor.u32 %v2466_v19, %v2215_v18  ;;  %v2435_v37 = vld [vmem:[#allocation2 + $0x264] sm:$0xf0]  ;;  %v2097_v40 = vld [vmem:[#allocation2 + $0x268] sm:$0xf0]  ;;  %v2087_v42 = vld [vmem:[#allocation2 + $0x220] sm:$0xf] }
  0x44   :  { %950 = vmatpush.bf16.msrb.mxu0 %v2008_v29  ;;  %v2220_v29 = vor.u32 %v2458_v21, %v2217_v22  ;;  %v2434_v43 = vld [vmem:[#allocation2 + $0x25c] sm:$0xf0]  ;;  %v2426_v45 = vld [vmem:[#allocation2 + $0x224] sm:$0xf]  ;;  %v2100_v47 = vor.u32 %v2427_v39, %v2097_v40  ;;  %v2419_v49 = vld [vmem:[#allocation2 + $0x1e4] sm:$0xf0] }
  0x45   :  { %964 = vmatpush.bf16.msrb.mxu1 %v2012_v32  ;;  %v2160_v32 = vor.u32 %v2451_v25, %v2159_v24  ;;  %v2089_v46 = vld [vmem:[#allocation2 + $0x260] sm:$0xf0]  ;;  %v2088_v50 = vor.u32 %v2434_v43, %v2087_v42  ;;  %v2411_v51 = vld [vmem:[#allocation2 + $0x1ac] sm:$0xf]  ;;  %v2023_v54 = vld [vmem:[#allocation2 + $0x1a0] sm:$0xf] }
  0x46   :  { %v2092_v53 = vor.u32 %v2426_v45, %v2089_v46  ;;  %v2418_v55 = vld [vmem:[#allocation2 + $0x1dc] sm:$0xf0]  ;;  %v2410_v57 = vld [vmem:[#allocation2 + $0x1a4] sm:$0xf]  ;;  %v2403_v62 = vld [vmem:[#allocation2 + $0x164] sm:$0xf0] }
  0x47   :  { %979 = vmatpush.bf16.msrb.mxu2 %v1952_v35  ;;  %993 = vmatpush.bf16.msrb.mxu3 %v1956_v38  ;;  %v2164_v35 = vor.u32 %v2443_v27, %v2161_v28  ;;  %v2152_v38 = vor.u32 %v2450_v31, %v2151_v30  ;;  %v2025_v58 = vld [vmem:[#allocation2 + $0x1e0] sm:$0xf0]  ;;  %v2024_v63 = vor.u32 %v2418_v55, %v2023_v54  ;;  %v2395_v0 = vld [vmem:[#allocation2 + $0x12c] sm:$0xf]  ;;  %v1959_v3 = vld [vmem:[#allocation2 + $0x120] sm:$0xf] }
  0x48   :  { %951 = vmatpush.bf16.msrb.mxu0 %v1944_v41  ;;  %v2156_v41 = vor.u32 %v2442_v33, %v2153_v34  ;;  %v2028_v2 = vor.u32 %v2410_v57, %v2025_v58  ;;  %v2402_v4 = vld [vmem:[#allocation2 + $0x15c] sm:$0xf0]  ;;  %v1961_v7 = vld [vmem:[#allocation2 + $0x160] sm:$0xf0]  ;;  %v2379_v12 = vld [vmem:[#allocation2 + $0xac] sm:$0xf] }
  0x49   :  { %965 = vmatpush.bf16.msrb.mxu1 %v1948_v44  ;;  %v2096_v44 = vor.u32 %v2435_v37, %v2095_v36  ;;  %v1960_v11 = vor.u32 %v2402_v4, %v1959_v3  ;;  %v1895_v15 = vld [vmem:[#allocation2 + $0xa0] sm:$0xf]  ;;  %v1897_v19 = vld [vmem:[#allocation2 + $0xe0] sm:$0xf0]  ;;  %v2371_v21 = vld [vmem:[#allocation2 + $0x64] sm:$0xf0] }
  0x4a   :  { %v2386_v16 = vld [vmem:[#allocation2 + $0xdc] sm:$0xf0]  ;;  %v1841_v24 = vld [vmem:[#allocation2 + $0x68] sm:$0xf0]  ;;  %v2303_v25 = vld [vmem:[#allocation2 + $0x3b8] sm:$0xf] }
  0x4b   :  { %980 = vmatpush.bf16.msrb.mxu2 %v1888_v48  ;;  %994 = vmatpush.bf16.msrb.mxu3 %v1892_v52  ;;  %v2031_v48 = vld [vmem:[#allocation2 + $0x1a8] sm:$0xf]  ;;  %v2033_v52 = vld [vmem:[#allocation2 + $0x1e8] sm:$0xf0]  ;;  %v2485_v27 = vld [vmem:[#allocation2 + $0x3f4] sm:$0xf0] }
  0x4c   :  { %952 = vmatpush.bf16.msrb.mxu0 %v1880_v56  ;;  %v2032_v56 = vor.u32 %v2419_v49, %v2031_v48  ;;  %v2036_v60 = vor.u32 %v2411_v51, %v2033_v52  ;;  %v2477_v28 = vld [vmem:[#allocation2 + $0x3bc] sm:$0xf]  ;;  %v1831_v31 = vld [vmem:[#allocation2 + $0x20] sm:$0xf]  ;;  %v2362_v33 = vld [vmem:[#allocation2 + $0x24] sm:$0xf]  ;;  %v2304_v39 = vor.u32 %v2485_v27, %v2303_v25 }
  0x4d   :  { %966 = vmatpush.bf16.msrb.mxu1 %v1884_v61  ;;  %v1967_v61 = vld [vmem:[#allocation2 + $0x128] sm:$0xf]  ;;  %v2295_v36 = vld [vmem:[#allocation2 + $0x3b0] sm:$0xf]  ;;  %v2476_v40 = vld [vmem:[#allocation2 + $0x3b4] sm:$0xf] }
  0x4e   :  { %v2484_v37 = vld [vmem:[#allocation2 + $0x3ec] sm:$0xf0]  ;;  %v2469_v45 = vld [vmem:[#allocation2 + $0x374] sm:$0xf0]  ;;  %v2461_v48 = vld [vmem:[#allocation2 + $0x33c] sm:$0xf] }
  0x4f   :  { %981 = vmatpush.bf16.msrb.mxu2 %v1824_v1  ;;  %995 = vmatpush.bf16.msrb.mxu3 %v1828_v5  ;;  %v1969_v1 = vld [vmem:[#allocation2 + $0x168] sm:$0xf0]  ;;  %v1968_v5 = vor.u32 %v2403_v62, %v1967_v61  ;;  %v2241_v49 = vld [vmem:[#allocation2 + $0x378] sm:$0xf0]  ;;  %v2231_v51 = vld [vmem:[#allocation2 + $0x330] sm:$0xf] }
  0x50   :  { %953 = vmatpush.bf16.msrb.mxu0 %v1816_v10  ;;  %v1972_v8 = vor.u32 %v2395_v0, %v1969_v1  ;;  %v2387_v10 = vld [vmem:[#allocation2 + $0xe4] sm:$0xf0]  ;;  %v2468_v52 = vld [vmem:[#allocation2 + $0x36c] sm:$0xf0]  ;;  %v2460_v54 = vld [vmem:[#allocation2 + $0x334] sm:$0xf] }
  0x51   :  { %967 = vmatpush.bf16.msrb.mxu1 %v1820_v13  ;;  %v1905_v13 = vld [vmem:[#allocation2 + $0xe8] sm:$0xf0]  ;;  %v2233_v55 = vld [vmem:[#allocation2 + $0x370] sm:$0xf0]  ;;  %v2175_v57 = vld [vmem:[#allocation2 + $0x2b8] sm:$0xf] }
  0x52   :  { %982 = vmatmul.bf16.vlgmr.msrb.gmra.mxu2 %v2638_v59  ;;  %996 = vmatmul.bf16.vlgmr.msrb.gmra.mxu3 %v2638_v59  ;;  %v1908_v22 = vor.u32 %v2379_v12, %v1905_v13  ;;  %v2453_v58 = vld [vmem:[#allocation2 + $0x2f4] sm:$0xf0]  ;;  %v2445_v61 = vld [vmem:[#allocation2 + $0x2bc] sm:$0xf]  ;;  %v2167_v0 = vld [vmem:[#allocation2 + $0x2b0] sm:$0xf] }
  0x53   :  { %1030 = vmatpush.bf16.msra.mxu2 %v2288_v6  ;;  %1044 = vmatpush.bf16.msra.mxu3 %v2292_v9  ;;  %v2394_v6 = vld [vmem:[#allocation2 + $0x124] sm:$0xf]  ;;  %v1903_v9 = vld [vmem:[#allocation2 + $0xa8] sm:$0xf]  ;;  %v2177_v62 = vld [vmem:[#allocation2 + $0x2f8] sm:$0xf0] }
  0x54   :  { %1002 = vmatpush.bf16.msra.mxu0 %v2280_v14  ;;  %968 = vmatmul.bf16.vlgmr.msrb.gmra.mxu1 %v2638_v59  ;;  %v1964_v14 = vor.u32 %v2394_v6, %v1961_v7  ;;  %v1904_v18 = vor.u32 %v2387_v10, %v1903_v9  ;;  %v2452_v1 = vld [vmem:[#allocation2 + $0x2ec] sm:$0xf0]  ;;  %v2444_v3 = vld [vmem:[#allocation2 + $0x2b4] sm:$0xf]  ;;  %v2111_v6 = vld [vmem:[#allocation2 + $0x238] sm:$0xf] }
  0x55   :  { %1016 = vmatpush.bf16.msra.mxu1 %v2284_v17  ;;  %954 = vmatmul.bf16.vlgmr.msrb.gmra.mxu0 %v2638_v59  ;;  %v2378_v17 = vld [vmem:[#allocation2 + $0xa4] sm:$0xf]  ;;  %v2169_v4 = vld [vmem:[#allocation2 + $0x2f0] sm:$0xf0]  ;;  %v2437_v7 = vld [vmem:[#allocation2 + $0x274] sm:$0xf0] }
  0x56   :  { %v1900_v30 = vor.u32 %v2378_v17, %v1897_v19  ;;  %v2429_v9 = vld [vmem:[#allocation2 + $0x23c] sm:$0xf]  ;;  %v2103_v12 = vld [vmem:[#allocation2 + $0x230] sm:$0xf]  ;;  %v2421_v19 = vld [vmem:[#allocation2 + $0x1f4] sm:$0xf0] }
  0x57   :  { %1031 = vmatpush.bf16.msra.mxu2 %v2224_v20  ;;  %1045 = vmatpush.bf16.msra.mxu3 %v2228_v23  ;;  %v1839_v20 = vld [vmem:[#allocation2 + $0x28] sm:$0xf]  ;;  %v2363_v23 = vld [vmem:[#allocation2 + $0x2c] sm:$0xf]  ;;  %v2113_v10 = vld [vmem:[#allocation2 + $0x278] sm:$0xf0] }
  0x58   :  { %1003 = vmatpush.bf16.msra.mxu0 %v2216_v26  ;;  %v1896_v26 = vor.u32 %v2386_v16, %v1895_v15  ;;  %v1840_v34 = vor.u32 %v2371_v21, %v1839_v20  ;;  %v2436_v13 = vld [vmem:[#allocation2 + $0x26c] sm:$0xf0]  ;;  %v2428_v15 = vld [vmem:[#allocation2 + $0x234] sm:$0xf]  ;;  %v2116_v17 = vor.u32 %v2429_v9, %v2113_v10  ;;  %v2413_v21 = vld [vmem:[#allocation2 + $0x1bc] sm:$0xf] }
  0x59   :  { %1017 = vmatpush.bf16.msra.mxu1 %v2220_v29  ;;  %v2305_v29 = vld [vmem:[#allocation2 + $0x3f8] sm:$0xf0]  ;;  %v2105_v16 = vld [vmem:[#allocation2 + $0x270] sm:$0xf0]  ;;  %v2104_v20 = vor.u32 %v2436_v13, %v2103_v12  ;;  %v2420_v25 = vld [vmem:[#allocation2 + $0x1ec] sm:$0xf0] }
  0x5a   :  { %v2308_v42 = vor.u32 %v2477_v28, %v2305_v29  ;;  %v2412_v27 = vld [vmem:[#allocation2 + $0x1b4] sm:$0xf]  ;;  %s2608_s0 = smov [#allocation8]   ;;  %s1782_s6 = sshll.u32 %s2713_s3, 4  ;;  %s1783_s6 = int_to_ptr.hbm [resolvable:$true] %s1782_s6 }
  0x5b   :  { %1032 = vmatpush.bf16.msra.mxu2 %v2160_v32  ;;  %1046 = vmatpush.bf16.msra.mxu3 %v2164_v35  ;;  %v2370_v32 = vld [vmem:[#allocation2 + $0x5c] sm:$0xf0]  ;;  %v1833_v35 = vld [vmem:[#allocation2 + $0x60] sm:$0xf0]  ;;  %v2041_v28 = vld [vmem:[#allocation2 + $0x1f0] sm:$0xf0] }
  0x5c   :  { %1004 = vmatpush.bf16.msra.mxu0 %v2152_v38  ;;  %v1844_v38 = vor.u32 %v2363_v23, %v1841_v24  ;;  %v1832_v43 = vor.u32 %v2370_v32, %v1831_v31  ;;  %v1836_v46 = vor.u32 %v2362_v33, %v1833_v35  ;;  %v2108_v23 = vor.u32 %v2428_v15, %v2105_v16  ;;  %v2039_v24 = vld [vmem:[#allocation2 + $0x1b0] sm:$0xf]  ;;  %v2405_v31 = vld [vmem:[#allocation2 + $0x174] sm:$0xf0]  ;;  %v2397_v33 = vld [vmem:[#allocation2 + $0x13c] sm:$0xf] }
  0x5d   :  { %1018 = vmatpush.bf16.msra.mxu1 %v2156_v41  ;;  %v2297_v41 = vld [vmem:[#allocation2 + $0x3f0] sm:$0xf0]  ;;  %v2040_v32 = vor.u32 %v2420_v25, %v2039_v24  ;;  %v2044_v35 = vor.u32 %v2412_v27, %v2041_v28  ;;  %v83_v24 = vld [vmem:[#allocation5 + $0x8] sm:$0xff]  ;;  %v101_v27 = vld [vmem:[#allocation5 + $0x98] sm:$0xff]  ;;  %s1780_s2 = sshll.u32 %s2608_s0, 4  ;;  %s1781_s2 = int_to_ptr.vmem [resolvable:$true] %s1780_s2 }
  0x5f   :  { %1033 = vmatpush.bf16.msra.mxu2 %v2096_v44  ;;  %1047 = vmatpush.bf16.msra.mxu3 %v2100_v47  ;;  %v2239_v44 = vld [vmem:[#allocation2 + $0x338] sm:$0xf]  ;;  %v2296_v47 = vor.u32 %v2484_v37, %v2295_v36  ;;  %v1975_v36 = vld [vmem:[#allocation2 + $0x130] sm:$0xf] }
  0x60   :  { %1005 = vmatpush.bf16.msra.mxu0 %v2088_v50  ;;  %v2300_v50 = vor.u32 %v2476_v40, %v2297_v41  ;;  %v2404_v37 = vld [vmem:[#allocation2 + $0x16c] sm:$0xf0]  ;;  %v1977_v40 = vld [vmem:[#allocation2 + $0x170] sm:$0xf0] }
  0x61   :  { %1019 = vmatpush.bf16.msra.mxu1 %v2092_v53  ;;  %v2240_v53 = vor.u32 %v2469_v45, %v2239_v44  ;;  %v1976_v44 = vor.u32 %v2404_v37, %v1975_v36  ;;  %v2381_v45 = vld [vmem:[#allocation2 + $0xbc] sm:$0xf] }
  0x63   :  { %1034 = vmatpush.bf16.msra.mxu2 %v2032_v56  ;;  %1048 = vmatpush.bf16.msra.mxu3 %v2036_v60  ;;  %v2244_v56 = vor.u32 %v2461_v48, %v2241_v49  ;;  %v2232_v60 = vor.u32 %v2468_v52, %v2231_v51  ;;  %v1911_v48 = vld [vmem:[#allocation2 + $0xb0] sm:$0xf]  ;;  %v2380_v51 = vld [vmem:[#allocation2 + $0xb4] sm:$0xf] }
  0x64   :  { %1006 = vmatpush.bf16.msra.mxu0 %v2024_v63  ;;  %v2236_v63 = vor.u32 %v2460_v54, %v2233_v55  ;;  %v2388_v49 = vld [vmem:[#allocation2 + $0xec] sm:$0xf0]  ;;  %v1913_v52 = vld [vmem:[#allocation2 + $0xf0] sm:$0xf0]  ;;  %v1855_v54 = vld [vmem:[#allocation2 + $0x38] sm:$0xf] }
  0x65   :  { %1020 = vmatpush.bf16.msra.mxu1 %v2028_v2  ;;  %v2176_v2 = vor.u32 %v2453_v58, %v2175_v57  ;;  %v2373_v55 = vld [vmem:[#allocation2 + $0x74] sm:$0xf0]  ;;  %v2365_v57 = vld [vmem:[#allocation2 + $0x3c] sm:$0xf] }
  0x66   :  { %v1857_v58 = vld [vmem:[#allocation2 + $0x78] sm:$0xf0] }
  0x67   :  { %1035 = vmatpush.bf16.msra.mxu2 %v1968_v5  ;;  %1049 = vmatpush.bf16.msra.mxu3 %v1972_v8  ;;  %v2180_v5 = vor.u32 %v2445_v61, %v2177_v62  ;;  %v2168_v8 = vor.u32 %v2452_v1, %v2167_v0  ;;  %v1847_v61 = vld [vmem:[#allocation2 + $0x30] sm:$0xf]  ;;  %v2364_v0 = vld [vmem:[#allocation2 + $0x34] sm:$0xf] }
  0x68   :  { %1007 = vmatpush.bf16.msra.mxu0 %v1960_v11  ;;  %v2172_v11 = vor.u32 %v2444_v3, %v2169_v4  ;;  %v2372_v62 = vld [vmem:[#allocation2 + $0x6c] sm:$0xf0]  ;;  %v1849_v1 = vld [vmem:[#allocation2 + $0x70] sm:$0xf0] }
  0x69   :  { %1021 = vmatpush.bf16.msra.mxu1 %v1964_v14  ;;  %v2112_v14 = vor.u32 %v2437_v7, %v2111_v6  ;;  %v1848_v3 = vor.u32 %v2372_v62, %v1847_v61  ;;  %v1852_v4 = vor.u32 %v2364_v0, %v1849_v1  ;;  %v88_v61 = vld [vmem:[#allocation5 + $0x30] sm:$0xff]  ;;  %v89_v62 = vld [vmem:[#allocation5 + $0x38] sm:$0xff] }
  0x6b   :  { %1036 = vmatpush.bf16.msra.mxu2 %v1904_v18  ;;  %1050 = vmatpush.bf16.msra.mxu3 %v1908_v22  ;;  %v2047_v18 = vld [vmem:[#allocation2 + $0x1b8] sm:$0xf]  ;;  %v2049_v22 = vld [vmem:[#allocation2 + $0x1f8] sm:$0xf0] }
  0x6c   :  { %1008 = vmatpush.bf16.msra.mxu0 %v1896_v26  ;;  %v2048_v26 = vor.u32 %v2421_v19, %v2047_v18  ;;  %v2052_v29 = vor.u32 %v2413_v21, %v2049_v22  ;;  %v99_v19 = vld [vmem:[#allocation5 + $0x88] sm:$0xff]  ;;  %v98_v21 = vld [vmem:[#allocation5 + $0x80] sm:$0xff] }
  0x6d   :  { %1022 = vmatpush.bf16.msra.mxu1 %v1900_v30  ;;  %v1983_v30 = vld [vmem:[#allocation2 + $0x138] sm:$0xf] }
  0x6f   :  { %1037 = vmatpush.bf16.msra.mxu2 %v1840_v34  ;;  %1051 = vmatpush.bf16.msra.mxu3 %v1844_v38  ;;  %v1985_v34 = vld [vmem:[#allocation2 + $0x178] sm:$0xf0]  ;;  %v1984_v38 = vor.u32 %v2405_v31, %v1983_v30 }
  0x70   :  { %1009 = vmatpush.bf16.msra.mxu0 %v1832_v43  ;;  %v1988_v41 = vor.u32 %v2397_v33, %v1985_v34  ;;  %v2389_v43 = vld [vmem:[#allocation2 + $0xf4] sm:$0xf0] }
  0x71   :  { %1023 = vmatpush.bf16.msra.mxu1 %v1836_v46  ;;  %v1921_v46 = vld [vmem:[#allocation2 + $0xf8] sm:$0xf0] }
  0x72   :  { %1038 = vmatmul.bf16.vlgmr.msra.gmra.mxu2 %v2638_v59  ;;  %1052 = vmatmul.bf16.vlgmr.msra.gmra.mxu3 %v2638_v59  ;;  %v85_v31 = vld [vmem:[#allocation5 + $0x18] sm:$0xff] }
  0x73   :  { %1086 = vmatpush.bf16.msrb.mxu2 %v2304_v39  ;;  %1100 = vmatpush.bf16.msrb.mxu3 %v2308_v42  ;;  %v2396_v39 = vld [vmem:[#allocation2 + $0x134] sm:$0xf]  ;;  %v1919_v42 = vld [vmem:[#allocation2 + $0xb8] sm:$0xf] }
  0x74   :  { %1058 = vmatpush.bf16.msrb.mxu0 %v2296_v47  ;;  %1024 = vmatmul.bf16.vlgmr.msra.gmra.mxu1 %v2638_v59  ;;  %v1980_v47 = vor.u32 %v2396_v39, %v1977_v40 }
  0x75   :  { %1072 = vmatpush.bf16.msrb.mxu1 %v2300_v50  ;;  %1010 = vmatmul.bf16.vlgmr.msra.gmra.mxu0 %v2638_v59  ;;  %v1920_v50 = vor.u32 %v2389_v43, %v1919_v42 }
  0x77   :  { %1087 = vmatpush.bf16.msrb.mxu2 %v2240_v53  ;;  %1101 = vmatpush.bf16.msrb.mxu3 %v2244_v56  ;;  %v1924_v53 = vor.u32 %v2381_v45, %v1921_v46  ;;  %v1912_v56 = vor.u32 %v2388_v49, %v1911_v48  ;;  %v103_v49 = vld [vmem:[#allocation5 + $0xa8] sm:$0xff] }
  0x78   :  { %1059 = vmatpush.bf16.msrb.mxu0 %v2232_v60  ;;  %v1916_v60 = vor.u32 %v2380_v51, %v1913_v52  ;;  %v86_v52 = vld [vmem:[#allocation5 + $0x20] sm:$0xff] }
  0x79   :  { %1073 = vmatpush.bf16.msrb.mxu1 %v2236_v63  ;;  %v1856_v63 = vor.u32 %v2373_v55, %v1855_v54  ;;  %v87_v54 = vld [vmem:[#allocation5 + $0x28] sm:$0xff]  ;;  %v104_v55 = vld [vmem:[#allocation5 + $0xb0] sm:$0xff] }
  0x7b   :  { %1088 = vmatpush.bf16.msrb.mxu2 %v2176_v2  ;;  %1102 = vmatpush.bf16.msrb.mxu3 %v2180_v5  ;;  %v1860_v2 = vor.u32 %v2365_v57, %v1857_v58  ;;  %v1114_v5 = vlaneseq  ;;  %v105_v57 = vld [vmem:[#allocation5 + $0xb8] sm:$0xff]  ;;  %v2607_v58 = vmov 1.0  }
  0x7c   :  { %1060 = vmatpush.bf16.msrb.mxu0 %v2168_v8 }
  0x7d   :  { %1074 = vmatpush.bf16.msrb.mxu1 %v2172_v11  ;;  %v2656_v6 = vand.u32 127, %v1114_v5 }
  0x7f   :  { %1089 = vmatpush.bf16.msrb.mxu2 %v2112_v14  ;;  %1103 = vmatpush.bf16.msrb.mxu3 %v2116_v17  ;;  %v1116_v7 = vadd.s32 128, %v2656_v6  ;;  %v1118_v9 = vadd.s32 384, %v2656_v6  ;;  %v1117_v12 = vadd.s32 256, %v2656_v6  ;;  %v1135_v13 = vand.u32 15, %v2656_v6 }
  0x80   :  { %1061 = vmatpush.bf16.msrb.mxu0 %v2104_v20  ;;  %v1119_v33 = vadd.s32 512, %v2656_v6  ;;  %v1120_v34 = vadd.s32 640, %v2656_v6  ;;  %v1121_v36 = vadd.s32 768, %v2656_v6  ;;  %v1122_v39 = vadd.s32 896, %v2656_v6 }
  0x81   :  { %1075 = vmatpush.bf16.msrb.mxu1 %v2108_v23  ;;  %v1142_v11 = vand.u32 15, %v1116_v7  ;;  %v1156_v16 = vand.u32 15, %v1118_v9  ;;  %v1149_v18 = vand.u32 15, %v1117_v12  ;;  %v1124_v0 = vadd.s32 1152, %v2656_v6 }
  0x82   :  { %v1163_v37 = vand.u32 15, %v1119_v33  ;;  %v1170_v40 = vand.u32 15, %v1120_v34  ;;  %v1177_v42 = vand.u32 15, %v1121_v36  ;;  %v1184_v45 = vand.u32 15, %v1122_v39 }
  0x83   :  { %1090 = vmatpush.bf16.msrb.mxu2 %v2048_v26  ;;  %1104 = vmatpush.bf16.msrb.mxu3 %v2052_v29  ;;  %v1324_v17 = vcvt.s32.f32 %v1142_v11  ;;  %v1326_v22 = vcvt.s32.f32 %v1156_v16  ;;  %v1325_v25 = vcvt.s32.f32 %v1149_v18  ;;  %v82_v26 = vld [vmem:[#allocation5] sm:$0xff]  ;;  %v100_v29 = vld [vmem:[#allocation5 + $0x90] sm:$0xff]  ;;  %v1126_v5 = vadd.s32 1408, %v2656_v6  ;;  %v107_v16 = vld [vmem:[#allocation5 + $0xc8] sm:$0xff] }
  0x84   :  { %1062 = vmatpush.bf16.msrb.mxu0 %v2040_v32  ;;  %v84_v32 = vld [vmem:[#allocation5 + $0x10] sm:$0xff]  ;;  %v1328_v46 = vcvt.s32.f32 %v1170_v40  ;;  %v1198_v7 = vand.u32 15, %v1124_v0  ;;  %v1129_v33 = vadd.s32 1792, %v2656_v6  ;;  %v110_v40 = vld [vmem:[#allocation5 + $0xe0] sm:$0xff] }
  0x85   :  { %1076 = vmatpush.bf16.msrb.mxu1 %v2044_v35  ;;  %v1212_v12 = vand.u32 15, %v1126_v5 }
  0x86   :  { %v1233_v39 = vand.u32 15, %v1129_v33 }
  0x87   :  { %1091 = vmatpush.bf16.msrb.mxu2 %v1984_v38  ;;  %1105 = vmatpush.bf16.msrb.mxu3 %v1988_v41 }
  0x88   :  { %1063 = vmatpush.bf16.msrb.mxu0 %v1976_v44  ;;  %v1327_v44 = vcvt.s32.f32 %v1163_v37 }
  0x89   :  { %1077 = vmatpush.bf16.msrb.mxu1 %v1980_v47  ;;  %v102_v47 = vld [vmem:[#allocation5 + $0xa0] sm:$0xff] }
  0x8b   :  { %1092 = vmatpush.bf16.msrb.mxu2 %v1920_v50  ;;  %1106 = vmatpush.bf16.msrb.mxu3 %v1924_v53  ;;  %v1329_v50 = vcvt.s32.f32 %v1177_v42  ;;  %v1330_v53 = vcvt.s32.f32 %v1184_v45  ;;  %v94_v45 = vld [vmem:[#allocation5 + $0x60] sm:$0xff] }
  0x8c   :  { %1064 = vmatpush.bf16.msrb.mxu0 %v1912_v56 }
  0x8d   :  { %1078 = vmatpush.bf16.msrb.mxu1 %v1916_v60 }
  0x8f   :  { %1093 = vmatpush.bf16.msrb.mxu2 %v1856_v63  ;;  %1107 = vmatpush.bf16.msrb.mxu3 %v1860_v2  ;;  %v1123_v63 = vadd.s32 1024, %v2656_v6  ;;  %v1125_v2 = vadd.s32 1280, %v2656_v6 }
  0x90   :  { %1065 = vmatpush.bf16.msrb.mxu0 %v1848_v3 }
  0x91   :  { %1079 = vmatpush.bf16.msrb.mxu1 %v1852_v4  ;;  %v1191_v3 = vand.u32 15, %v1123_v63  ;;  %v1205_v9 = vand.u32 15, %v1125_v2 }
  0x92   :  { %1094 = vmatmul.bf16.vlgmr.msrb.gmra.mxu2 %v2638_v59  ;;  %1108 = vmatmul.bf16.vlgmr.msrb.gmra.mxu3 %v2638_v59 }
  0x93   :  { %1066 = vmatmul.bf16.vlgmr.msrb.gmra.mxu0 %v2638_v59  ;;  %v1331_v11 = vcvt.s32.f32 %v1191_v3 }
  0x94   :  { %1080 = vmatmul.bf16.vlgmr.msrb.gmra.mxu1 %v2638_v59  ;;  %v1323_v59 = vcvt.s32.f32 %v1135_v13  ;;  %v1332_v13 = vcvt.s32.f32 %v1198_v7 }
  0xb1   :  { %v913_v8 = vpop.f32.mrf.mxu1 }
  0xb2   :  { %v899_v10 = vpop.f32.mrf.mxu0  ;;  %vm1340_vm0 = vcmp.eq.f32.partialorder %v913_v8, %v1324_v17 }
  0xb3   :  { %vm1339_vm2 = vcmp.eq.f32.partialorder %v899_v10, %v1323_v59 }
  0xb5   :  { %v941_v14 = vpop.f32.mrf.mxu3  ;;  %v927_v15 = vpop.f32.mrf.mxu2 }
  0xb6   :  { %vm1342_vm4 = vcmp.eq.f32.partialorder %v941_v14, %v1326_v22  ;;  %vm1341_vm6 = vcmp.eq.f32.partialorder %v927_v15, %v1325_v25  ;;  %v106_v14 = vld [vmem:[#allocation5 + $0xc0] sm:$0xff] }
  0xb9   :  { %v915_v20 = vpop.f32.mrf.mxu1 }
  0xba   :  { %v901_v23 = vpop.f32.mrf.mxu0  ;;  %vm1356_vm1 = vcmp.eq.f32.partialorder %v915_v20, %v1324_v17  ;;  %v1333_v17 = vcvt.s32.f32 %v1205_v9  ;;  %v91_v20 = vld [vmem:[#allocation5 + $0x48] sm:$0xff] }
  0xbb   :  { %vm1355_vm3 = vcmp.eq.f32.partialorder %v901_v23, %v1323_v59  ;;  %2312 = vmatpush.msk.msra.mxu1 %vm1356_vm1, %v99_v19  ;;  %v90_v59 = vld [vmem:[#allocation5 + $0x40] sm:$0xff]  ;;  %v1334_v19 = vcvt.s32.f32 %v1212_v12  ;;  %v109_v23 = vld [vmem:[#allocation5 + $0xd8] sm:$0xff] }
  0xbc   :  { %2309 = vmatpush.msk.msra.mxu0 %vm1355_vm3, %v98_v21  ;;  %v108_v21 = vld [vmem:[#allocation5 + $0xd0] sm:$0xff] }
  0xbd   :  { %v943_v28 = vpop.f32.mrf.mxu3  ;;  %2313 = vmatpush.msk.msra.mxu1 %vm1340_vm0, %v83_v24  ;;  %v929_v30 = vpop.f32.mrf.mxu2 }
  0xbe   :  { %vm1358_vm5 = vcmp.eq.f32.partialorder %v943_v28, %v1326_v22  ;;  %2310 = vmatpush.msk.msra.mxu0 %vm1339_vm2, %v82_v26  ;;  %vm1357_vm7 = vcmp.eq.f32.partialorder %v929_v30, %v1325_v25  ;;  %2314 = vmatmul.msk.f32.vlgmr.msra.gmra.mxu1 %vm1419_vm12, %v2607_v58  ;;  %v92_v25 = vld [vmem:[#allocation5 + $0x50] sm:$0xff]  ;;  %v93_v26 = vld [vmem:[#allocation5 + $0x58] sm:$0xff]  ;;  %v1128_v28 = vadd.s32 1664, %v2656_v6 }
  0xbf   :  { %2318 = vmatpush.msk.msra.mxu3 %vm1358_vm5, %v101_v27  ;;  %2315 = vmatpush.msk.msra.mxu2 %vm1357_vm7, %v100_v29  ;;  %v1127_v27 = vadd.s32 1536, %v2656_v6 }
  0xc0   :  { %2311 = vmatmul.msk.f32.vlgmr.msra.gmra.mxu0 %vm1419_vm12, %v2607_v58 }
  0xc1   :  { %2319 = vmatpush.msk.msra.mxu3 %vm1342_vm4, %v85_v31  ;;  %2316 = vmatpush.msk.msra.mxu2 %vm1341_vm6, %v84_v32  ;;  %v1219_v30 = vand.u32 15, %v1127_v27  ;;  %v1226_v32 = vand.u32 15, %v1128_v28 }
  0xc2   :  { %2317 = vmatmul.msk.f32.vlgmr.msra.gmra.mxu2 %vm1419_vm12, %v2607_v58  ;;  %2320 = vmatmul.msk.f32.vlgmr.msra.gmra.mxu3 %vm1419_vm12, %v2607_v58 }
  0xc3   :  { %v1335_v36 = vcvt.s32.f32 %v1219_v30 }
  0xd1   :  { %v969_v38 = vpop.f32.mrf.mxu1 }
  0xd2   :  { %v955_v35 = vpop.f32.mrf.mxu0  ;;  %vm1344_vm10 = vcmp.eq.f32.partialorder %v969_v38, %v1328_v46  ;;  %v1336_v38 = vcvt.s32.f32 %v1226_v32 }
  0xd3   :  { %vm1343_vm8 = vcmp.eq.f32.partialorder %v955_v35, %v1327_v44  ;;  %v1130_v35 = vadd.s32 1920, %v2656_v6 }
  0xd5   :  { %v983_v41 = vpop.f32.mrf.mxu2  ;;  %v997_v43 = vpop.f32.mrf.mxu3 }
  0xd6   :  { %vm1345_vm13 = vcmp.eq.f32.partialorder %v983_v41, %v1329_v50  ;;  %vm1346_vm15 = vcmp.eq.f32.partialorder %v997_v43, %v1330_v53  ;;  %v1240_v41 = vand.u32 15, %v1130_v35  ;;  %v111_v43 = vld [vmem:[#allocation5 + $0xe8] sm:$0xff] }
  0xd8   :  { %v1338_v6 = vcvt.s32.f32 %v1240_v41 }
  0xd9   :  { %v971_v51 = vpop.f32.mrf.mxu1 }
  0xda   :  { %v957_v48 = vpop.f32.mrf.mxu0  ;;  %vm1360_vm11 = vcmp.eq.f32.partialorder %v971_v51, %v1328_v46  ;;  %v95_v46 = vld [vmem:[#allocation5 + $0x68] sm:$0xff] }
  0xdb   :  { %vm1359_vm9 = vcmp.eq.f32.partialorder %v957_v48, %v1327_v44  ;;  %2324 = vmatpush.msk.msrb.mxu1 %vm1360_vm11, %v103_v49  ;;  %v112_v48 = vld [vmem:[#allocation5 + $0xf0] sm:$0xff] }
  0xdc   :  { %2321 = vmatpush.msk.msrb.mxu0 %vm1359_vm9, %v102_v47  ;;  %v1337_v47 = vcvt.s32.f32 %v1233_v39 }
  0xdd   :  { %v985_v56 = vpop.f32.mrf.mxu2  ;;  %v999_v60 = vpop.f32.mrf.mxu3  ;;  %2325 = vmatpush.msk.msrb.mxu1 %vm1344_vm10, %v87_v54 }
  0xde   :  { %2322 = vmatpush.msk.msrb.mxu0 %vm1343_vm8, %v86_v52  ;;  %vm1361_vm14 = vcmp.eq.f32.partialorder %v985_v56, %v1329_v50  ;;  %vm1362_vm0 = vcmp.eq.f32.partialorder %v999_v60, %v1330_v53  ;;  %2326 = vmatmul.msk.f32.vlgmr.msrb.gmra.mxu1 %vm1419_vm12, %v2607_v58  ;;  %v113_v50 = vld [vmem:[#allocation5 + $0xf8] sm:$0xff]  ;;  %v96_v52 = vld [vmem:[#allocation5 + $0x70] sm:$0xff] }
  0xdf   :  { %2327 = vmatpush.msk.msrb.mxu2 %vm1361_vm14, %v104_v55  ;;  %2330 = vmatpush.msk.msrb.mxu3 %vm1362_vm0, %v105_v57  ;;  %v97_v53 = vld [vmem:[#allocation5 + $0x78] sm:$0xff] }
  0xe0   :  { %2323 = vmatmul.msk.f32.vlgmr.msrb.gmra.mxu0 %vm1419_vm12, %v2607_v58 }
  0xe1   :  { %2328 = vmatpush.msk.msrb.mxu2 %vm1345_vm13, %v88_v61  ;;  %2331 = vmatpush.msk.msrb.mxu3 %vm1346_vm15, %v89_v62 }
  0xe2   :  { %2329 = vmatmul.msk.f32.vlgmr.msrb.gmra.mxu2 %vm1419_vm12, %v2607_v58  ;;  %2332 = vmatmul.msk.f32.vlgmr.msrb.gmra.mxu3 %vm1419_vm12, %v2607_v58 }
  0xf1   :  { %v1025_v4 = vpop.f32.mrf.mxu1 }
  0xf2   :  { %v1011_v1 = vpop.f32.mrf.mxu0  ;;  %vm1348_vm3 = vcmp.eq.f32.partialorder %v1025_v4, %v1332_v13 }
  0xf3   :  { %vm1347_vm1 = vcmp.eq.f32.partialorder %v1011_v1, %v1331_v11 }
  0xf5   :  { %v1039_v8 = vpop.f32.mrf.mxu2  ;;  %v1053_v10 = vpop.f32.mrf.mxu3 }
  0xf6   :  { %vm1349_vm5 = vcmp.eq.f32.partialorder %v1039_v8, %v1333_v17  ;;  %vm1350_vm7 = vcmp.eq.f32.partialorder %v1053_v10, %v1334_v19 }
  0xf9   :  { %v1027_v18 = vpop.f32.mrf.mxu1 }
  0xfa   :  { %v1013_v15 = vpop.f32.mrf.mxu0  ;;  %vm1364_vm4 = vcmp.eq.f32.partialorder %v1027_v18, %v1332_v13 }
  0xfb   :  { %vm1363_vm2 = vcmp.eq.f32.partialorder %v1013_v15, %v1331_v11  ;;  %2336 = vmatpush.msk.msra.mxu1 %vm1364_vm4, %v107_v16 }
  0xfc   :  { %2333 = vmatpush.msk.msra.mxu0 %vm1363_vm2, %v106_v14 }
  0xfd   :  { %v1041_v22 = vpop.f32.mrf.mxu2  ;;  %v1055_v24 = vpop.f32.mrf.mxu3  ;;  %2337 = vmatpush.msk.msra.mxu1 %vm1348_vm3, %v91_v20 }
  0xfe   :  { %2334 = vmatpush.msk.msra.mxu0 %vm1347_vm1, %v90_v59  ;;  %vm1365_vm6 = vcmp.eq.f32.partialorder %v1041_v22, %v1333_v17  ;;  %vm1366_vm8 = vcmp.eq.f32.partialorder %v1055_v24, %v1334_v19  ;;  %2338 = vmatmul.msk.f32.vlgmr.msra.gmra.mxu1 %vm1419_vm12, %v2607_v58 }
  0xff   :  { %2335 = vmatmul.msk.f32.vlgmr.msra.gmra.mxu0 %vm1419_vm12, %v2607_v58  ;;  %2339 = vmatpush.msk.msra.mxu2 %vm1365_vm6, %v108_v21 }
 0x100   :  { %2342 = vmatpush.msk.msra.mxu3 %vm1366_vm8, %v109_v23 }
 0x101   :  { %2340 = vmatpush.msk.msra.mxu2 %vm1349_vm5, %v92_v25 }
 0x102   :  { %2343 = vmatpush.msk.msra.mxu3 %vm1350_vm7, %v93_v26  ;;  %2341 = vmatmul.msk.f32.vlgmr.msra.gmra.mxu2 %vm1419_vm12, %v2607_v58 }
 0x103   :  { %2344 = vmatmul.msk.f32.vlgmr.msra.gmra.mxu3 %vm1419_vm12, %v2607_v58 }
 0x110   :  { %v1067_v29 = vpop.f32.mrf.mxu0 }
 0x111   :  { %v1081_v31 = vpop.f32.mrf.mxu1  ;;  %vm1351_vm9 = vcmp.eq.f32.partialorder %v1067_v29, %v1335_v36 }
 0x112   :  { %vm1352_vm11 = vcmp.eq.f32.partialorder %v1081_v31, %v1336_v38 }
 0x115   :  { %v1095_v34 = vpop.f32.mrf.mxu2  ;;  %v1109_v37 = vpop.f32.mrf.mxu3 }
 0x116   :  { %vm1353_vm0 = vcmp.eq.f32.partialorder %v1095_v34, %v1337_v47  ;;  %vm1354_vm1 = vcmp.eq.f32.partialorder %v1109_v37, %v1338_v6 }
 0x118   :  { %v1069_v42 = vpop.f32.mrf.mxu0 }
 0x119   :  { %vm1367_vm10 = vcmp.eq.f32.partialorder %v1069_v42, %v1335_v36  ;;  %v1083_v44 = vpop.f32.mrf.mxu1 }
 0x11a   :  { %vm1368_vm13 = vcmp.eq.f32.partialorder %v1083_v44, %v1336_v38  ;;  %2345 = vmatpush.msk.msrb.mxu0 %vm1367_vm10, %v110_v40 }
 0x11b   :  { %2348 = vmatpush.msk.msrb.mxu1 %vm1368_vm13, %v111_v43 }
 0x11c   :  { %2346 = vmatpush.msk.msrb.mxu0 %vm1351_vm9, %v94_v45 }
 0x11d   :  { %v1097_v49 = vpop.f32.mrf.mxu2  ;;  %v1111_v51 = vpop.f32.mrf.mxu3  ;;  %2349 = vmatpush.msk.msrb.mxu1 %vm1352_vm11, %v95_v46  ;;  %2347 = vmatmul.msk.f32.vlgmr.msrb.gmra.mxu0 %vm1419_vm12, %v2607_v58 }
 0x11e   :  { %vm1369_vm14 = vcmp.eq.f32.partialorder %v1097_v49, %v1337_v47  ;;  %vm1370_vm15 = vcmp.eq.f32.partialorder %v1111_v51, %v1338_v6  ;;  %2350 = vmatmul.msk.f32.vlgmr.msrb.gmra.mxu1 %vm1419_vm12, %v2607_v58 }
 0x11f   :  { %2351 = vmatpush.msk.msrb.mxu2 %vm1369_vm14, %v112_v48  ;;  %2354 = vmatpush.msk.msrb.mxu3 %vm1370_vm15, %v113_v50 }
 0x121   :  { %2352 = vmatpush.msk.msrb.mxu2 %vm1353_vm0, %v96_v52  ;;  %2355 = vmatpush.msk.msrb.mxu3 %vm1354_vm1, %v97_v53 }
 0x122   :  { %2353 = vmatmul.msk.f32.vlgmr.msrb.gmra.mxu2 %vm1419_vm12, %v2607_v58  ;;  %2356 = vmatmul.msk.f32.vlgmr.msrb.gmra.mxu3 %vm1419_vm12, %v2607_v58 }
 0x13b   :  { %v1460_v56 = vpop.f32.mrf.mxu1 }
 0x13c   :  { %v1744_v57 = vsub.f32 0.0, %v1460_v56 }
 0x13d   :  { %v1440_v54 = vpop.f32.mrf.mxu0 }
 0x13e   :  { %v1743_v55 = vsub.f32 0.0, %v1440_v54  ;;  %1760 = vst [vmem:[#allocation8 + $0x8] sm:$0xff] %v1744_v57 }
 0x140   :  { %1759 = vst [vmem:[#allocation8] sm:$0xff] %v1743_v55 }
 0x145   :  { %v1480_v60 = vpop.f32.mrf.mxu2  ;;  %v1500_v62 = vpop.f32.mrf.mxu3 }
 0x146   :  { %v1745_v61 = vsub.f32 0.0, %v1480_v60  ;;  %v1746_v63 = vsub.f32 0.0, %v1500_v62 }
 0x148   :  { %1761 = vst [vmem:[#allocation8 + $0x10] sm:$0xff] %v1745_v61 }
 0x149   :  { %1762 = vst [vmem:[#allocation8 + $0x18] sm:$0xff] %v1746_v63 }
 0x15b   :  { %v1540_v2 = vpop.f32.mrf.mxu1 }
 0x15c   :  { %v1748_v3 = vsub.f32 0.0, %v1540_v2 }
 0x15d   :  { %v1520_v0 = vpop.f32.mrf.mxu0 }
 0x15e   :  { %v1747_v1 = vsub.f32 0.0, %v1520_v0  ;;  %1764 = vst [vmem:[#allocation8 + $0x28] sm:$0xff] %v1748_v3 }
 0x160   :  { %1763 = vst [vmem:[#allocation8 + $0x20] sm:$0xff] %v1747_v1 }
 0x165   :  { %v1560_v4 = vpop.f32.mrf.mxu2  ;;  %v1580_v5 = vpop.f32.mrf.mxu3 }
 0x166   :  { %v1749_v58 = vsub.f32 0.0, %v1560_v4  ;;  %v1750_v7 = vsub.f32 0.0, %v1580_v5 }
 0x168   :  { %1765 = vst [vmem:[#allocation8 + $0x30] sm:$0xff] %v1749_v58 }
 0x169   :  { %1766 = vst [vmem:[#allocation8 + $0x38] sm:$0xff] %v1750_v7 }
 0x17b   :  { %v1620_v10 = vpop.f32.mrf.mxu1 }
 0x17c   :  { %v1600_v8 = vpop.f32.mrf.mxu0  ;;  %v1752_v11 = vsub.f32 0.0, %v1620_v10 }
 0x17d   :  { %v1751_v9 = vsub.f32 0.0, %v1600_v8 }
 0x17e   :  { %1768 = vst [vmem:[#allocation8 + $0x48] sm:$0xff] %v1752_v11 }
 0x17f   :  { %1767 = vst [vmem:[#allocation8 + $0x40] sm:$0xff] %v1751_v9 }
 0x185   :  { %v1640_v12 = vpop.f32.mrf.mxu2 }
 0x186   :  { %v1753_v13 = vsub.f32 0.0, %v1640_v12  ;;  %v1660_v14 = vpop.f32.mrf.mxu3 }
 0x187   :  { %v1754_v15 = vsub.f32 0.0, %v1660_v14 }
 0x188   :  { %1769 = vst [vmem:[#allocation8 + $0x50] sm:$0xff] %v1753_v13 }
 0x189   :  { %1770 = vst [vmem:[#allocation8 + $0x58] sm:$0xff] %v1754_v15 }
 0x19a   :  { %v1680_v16 = vpop.f32.mrf.mxu0 }
 0x19b   :  { %v1755_v17 = vsub.f32 0.0, %v1680_v16  ;;  %v1700_v18 = vpop.f32.mrf.mxu1 }
 0x19c   :  { %v1756_v59 = vsub.f32 0.0, %v1700_v18 }
 0x19d   :  { %1771 = vst [vmem:[#allocation8 + $0x60] sm:$0xff] %v1755_v17 }
 0x19e   :  { %1772 = vst [vmem:[#allocation8 + $0x68] sm:$0xff] %v1756_v59 }
 0x1a5   :  { %v1720_v19 = vpop.f32.mrf.mxu2  ;;  %v1740_v21 = vpop.f32.mrf.mxu3 }
 0x1a6   :  { %v1757_v20 = vsub.f32 0.0, %v1720_v19  ;;  %v1758_v22 = vsub.f32 0.0, %v1740_v21 }
 0x1a8   :  { %1773 = vst [vmem:[#allocation8 + $0x70] sm:$0xff] %v1757_v20 }
 0x1a9   :  { %1774 = vst [vmem:[#allocation8 + $0x78] sm:$0xff] %v1758_v22 }
 0x1aa   :  { %1785 = dma.vmem_to_hbm [thread:$0]  %s1781_s2, 2048, %s1783_s6, [#allocation4]  }
 0x1ab   :  { %2597 = dma.done.wait [#allocation4], 2048  }
 0x1ac   :  { %2598 = vsyncadd [#allocation4], 4294965248 }
 0x1ad   :  { %1790 = vsyncpa [#allocation3], 1 }
 0x1ae   :  { %1791 = vsyncpa [#allocation6], 1 }
 0x1af   :  { %1792 = vsyncpa [#allocation4], 1 }

</bundles_post_ra>
